<compile_context>
chip_gen: v7x
topology: tpu7x:2x2x1
jax: 0.10.0
libtpu: 0.0.40
codegen_flags: <defaults>
</compile_context>

<pallas_src>
import functools

import jax
import jax.numpy as jnp
from jax.experimental import pallas as pl
from jax.experimental.pallas import tpu as pltpu


def _round_up(n, m):
    return ((n + m - 1) // m) * m


def _autoencoder_kernel(
    x_ref,
    w1_ref, b1_ref,
    w2_ref, b2_ref,
    w3_ref, b3_ref,
    w4_ref, b4_ref,
    out_ref,
):
    """Fused 4-layer MLP: (Linear+ReLU) x3 + Linear+Sigmoid on one batch tile.

    x may arrive as f32 (aligned fast path, no wrapper cast) or bf16 (padded
    path); it is cast to bf16 in-register for the MXU. Accumulation, bias-add,
    ReLU and the sigmoid run in f32; the output is stored as bf16.
    """
    x = x_ref[...].astype(jnp.bfloat16)                         # [bb, Dp]

    # encoder layer 1: Linear(input, 2h) + ReLU
    h = jnp.dot(x, w1_ref[...], preferred_element_type=jnp.float32) + b1_ref[...]
    h = jnp.maximum(h, 0.0).astype(jnp.bfloat16)

    # encoder layer 2: Linear(2h, h) + ReLU
    h = jnp.dot(h, w2_ref[...], preferred_element_type=jnp.float32) + b2_ref[...]
    h = jnp.maximum(h, 0.0).astype(jnp.bfloat16)

    # decoder layer 1: Linear(h, 2h) + ReLU
    h = jnp.dot(h, w3_ref[...], preferred_element_type=jnp.float32) + b3_ref[...]
    h = jnp.maximum(h, 0.0).astype(jnp.bfloat16)

    # decoder layer 2: Linear(2h, input) + Sigmoid
    logits = jnp.dot(h, w4_ref[...], preferred_element_type=jnp.float32) + b4_ref[...]
    out_ref[...] = jax.nn.sigmoid(logits).astype(out_ref.dtype)


@functools.partial(jax.jit, static_argnames=("block_b", "out_dtype"))
def autoencoder_forward(x, params, *, block_b=512, out_dtype=jnp.bfloat16):
    """x: [B, input_size] -> [B, input_size] reconstruction in (0, 1).

    Returns bf16 by default (halves the output HBM stream); pass
    out_dtype=jnp.float32 to upcast in the wrapper if full precision is needed.
    """
    (w1, b1), (w2, b2), (w3, b3), (w4, b4) = params
    B, D = x.shape
    H2 = w1.shape[1]            # hidden_size * 2
    H = w2.shape[1]             # hidden_size

    # Lane-pad every feature dim to a multiple of 128.
    Dp = _round_up(D, 128)
    H2p = _round_up(H2, 128)
    Hp = _round_up(H, 128)

    # Batch tile: multiple of 16 (bf16 packs (16,128) per vreg), capped at
    # block_b, sized so the grid has >= 4 steps whenever B allows it — both
    # v7x TensorCores then split the "parallel" axis with >= 2 steps each,
    # keeping in-DMA / compute / out-DMA overlapped on all generations.
    bb = min(block_b, max(16, _round_up(pl.cdiv(B, 4), 16)))
    Bp = _round_up(B, bb)

    def pad_w(w, rows, cols):
        r, c = w.shape
        return jnp.pad(w, ((0, rows - r), (0, cols - c))).astype(jnp.bfloat16)

    def pad_b(b, cols):
        return jnp.pad(b, ((0, 0), (0, cols - b.shape[1]))).astype(jnp.float32)

    w1p, b1p = pad_w(w1, Dp, H2p), pad_b(b1, H2p)
    w2p, b2p = pad_w(w2, H2p, Hp), pad_b(b2, Hp)
    w3p, b3p = pad_w(w3, Hp, H2p), pad_b(b3, H2p)
    w4p, b4p = pad_w(w4, H2p, Dp), pad_b(b4, Dp)

    needs_pad = (Bp != B) or (Dp != D)
    if needs_pad:
        # Ragged case only: one pad pass over x; cast to bf16 while copying so
        # the kernel-side read is 2 B/elem.
        xk = jnp.pad(x, ((0, Bp - B), (0, Dp - D))).astype(jnp.bfloat16)
    else:
        # Aligned fast path: no wrapper-side pad/cast pass over x at all; the
        # kernel reads x in its native dtype and casts in-register.
        xk = x

    grid = (Bp // bb,)

    def resident(shape):
        # block == full array, constant index_map -> stays in VMEM across all
        # grid steps; single-buffered since it is never re-DMA'd.
        return pl.BlockSpec(shape, lambda i: (0,) * len(shape),
                            pipeline_mode=pl.Buffered(1))

    flops = 2 * Bp * (Dp * H2p + H2p * Hp + Hp * H2p + H2p * Dp)
    weight_bytes = 2 * (Dp * H2p + H2p * Hp + Hp * H2p + H2p * Dp)     # bf16
    bias_bytes = 4 * (H2p + Hp + H2p + Dp)                             # f32
    x_bytes = Bp * Dp * xk.dtype.itemsize
    out_bytes = Bp * Dp * 2                                            # bf16 out
    cost = pl.CostEstimate(
        flops=flops,
        transcendentals=Bp * Dp,            # sigmoid exp per output element
        bytes_accessed=x_bytes + out_bytes + weight_bytes + bias_bytes,
    )

    out = pl.pallas_call(
        _autoencoder_kernel,
        out_shape=jax.ShapeDtypeStruct((Bp, Dp), jnp.bfloat16),
        grid_spec=pltpu.PrefetchScalarGridSpec(
            num_scalar_prefetch=0,
            grid=grid,
            in_specs=[
                pl.BlockSpec((bb, Dp), lambda i: (i, 0)),   # x batch tile
                resident(w1p.shape), resident(b1p.shape),
                resident(w2p.shape), resident(b2p.shape),
                resident(w3p.shape), resident(b3p.shape),
                resident(w4p.shape), resident(b4p.shape),
            ],
            out_specs=pl.BlockSpec((bb, Dp), lambda i: (i, 0)),
        ),
        compiler_params=pltpu.CompilerParams(
            dimension_semantics=("parallel",),
            # Correct for tiles <= 1024 rows on v5e/v6e/v7x; only raise this if
            # block_b is pushed beyond ~2048 on the 128 MiB-VMEM parts.
            vmem_limit_bytes=32 * 1024 * 1024,
        ),
        cost_estimate=cost,
    )(xk, w1p, b1p, w2p, b2p, w3p, b3p, w4p, b4p)

    if needs_pad:
        out = out[:B, :D]
    if out_dtype is not None and out.dtype != jnp.dtype(out_dtype):
        out = out.astype(out_dtype)
    return out


def init_params(key, input_size, hidden_size, dtype=jnp.float32):
    """Init mimicking nn.Linear's uniform(-1/sqrt(fan_in), 1/sqrt(fan_in)).

    Weights stored as [in_features, out_features] (pre-transposed for the
    kernel); biases as [1, out_features].
    """
    dims = [
        (input_size, hidden_size * 2),   # encoder Linear 1
        (hidden_size * 2, hidden_size),  # encoder Linear 2
        (hidden_size, hidden_size * 2),  # decoder Linear 1
        (hidden_size * 2, input_size),   # decoder Linear 2
    ]
    params = []
    for fan_in, fan_out in dims:
        key, kw, kb = jax.random.split(key, 3)
        bound = 1.0 / jnp.sqrt(fan_in)
        w = jax.random.uniform(kw, (fan_in, fan_out), dtype, -bound, bound)
        b = jax.random.uniform(kb, (1, fan_out), dtype, -bound, bound)
        params.append((w, b))
    return params


def reference_forward_bf16(x, params):
    """Pure-JAX reference matching the kernel arithmetic (bf16 MXU, f32 acc)."""
    (w1, b1), (w2, b2), (w3, b3), (w4, b4) = params

    def lin(h, w, b):
        return jnp.dot(h.astype(jnp.bfloat16), w.astype(jnp.bfloat16),
                       preferred_element_type=jnp.float32) + b.astype(jnp.float32)

    h = jnp.maximum(lin(x, w1, b1), 0.0)
    h = jnp.maximum(lin(h, w2, b2), 0.0)
    h = jnp.maximum(lin(h, w3, b3), 0.0)
    return jax.nn.sigmoid(lin(h, w4, b4))


def reference_forward_f32(x, params):
    """Full-precision reference of the original module semantics."""
    (w1, b1), (w2, b2), (w3, b3), (w4, b4) = params
    h = jnp.maximum(x @ w1 + b1, 0.0)
    h = jnp.maximum(h @ w2 + b2, 0.0)
    h = jnp.maximum(h @ w3 + b3, 0.0)
    return jax.nn.sigmoid(h @ w4 + b4)


if __name__ == "__main__":
    # Shapes consistent with the module: input_size=256, hidden_size=64.
    # batch=512 with the default tile policy -> 4 grid steps of 128 rows, so
    # v7x's two TensorCores each process 2 "parallel" steps; D=256 is already
    # lane-aligned, so the no-pad / no-cast fast path is exercised.
    batch = 512
    input_size = 256
    hidden_size = 64

    key = jax.random.PRNGKey(0)
    key, kx = jax.random.split(key)
    x = jax.random.normal(kx, (batch, input_size), jnp.float32)

    params = init_params(key, input_size, hidden_size)

    out = autoencoder_forward(x, params)
    out = jax.block_until_ready(out)

    assert out.shape == (batch, input_size)
    assert out.dtype == jnp.bfloat16

    outf = out.astype(jnp.float32)
    ref_bf16 = reference_forward_bf16(x, params).astype(jnp.float32)
    ref_f32 = reference_forward_f32(x, params)
    # bf16 output of a sigmoid in (0,1): abs rounding error <= ~2e-3.
    assert jnp.allclose(outf, ref_bf16, atol=1e-2, rtol=1e-2), "mismatch vs bf16 reference"
    assert jnp.allclose(outf, ref_f32, atol=5e-2, rtol=5e-2), "mismatch vs f32 reference"

    # TODO(synk): predict()/training (MSE loss + optimizer) are host-side Torch
    # conveniences, not part of the forward pass, and are not ported.

    print("KERNEL_OK")
</pallas_src>

<mosaic_0001>
module attributes {stable_mosaic.version = 11 : i64} {
  func.func @_autoencoder_kernel(%arg0: i32, %arg1: memref<128x256xf32, #tpu.memory_space<vmem>>, %arg2: memref<256x128xbf16, #tpu.memory_space<vmem>>, %arg3: memref<1x128xf32, #tpu.memory_space<vmem>>, %arg4: memref<128x128xbf16, #tpu.memory_space<vmem>>, %arg5: memref<1x128xf32, #tpu.memory_space<vmem>>, %arg6: memref<128x128xbf16, #tpu.memory_space<vmem>>, %arg7: memref<1x128xf32, #tpu.memory_space<vmem>>, %arg8: memref<128x256xbf16, #tpu.memory_space<vmem>>, %arg9: memref<1x256xf32, #tpu.memory_space<vmem>>, %arg10: memref<128x256xbf16, #tpu.memory_space<vmem>>) attributes {dimension_semantics = [#tpu.dimension_semantics<parallel>], iteration_bounds = array<i64: 4>, scalar_prefetch = 0 : i64, scratch_operands = 0 : i64, tpu.core_type = #tpu.core_type<tc>, window_params = [{transform_indices = @transform_0, window_bounds = array<i64: 128, 256>}, {pipeline_mode = #tpu.pipeline_mode<synchronous>, transform_indices = @transform_1, window_bounds = array<i64: 256, 128>}, {pipeline_mode = #tpu.pipeline_mode<synchronous>, transform_indices = @transform_2, window_bounds = array<i64: 1, 128>}, {pipeline_mode = #tpu.pipeline_mode<synchronous>, transform_indices = @transform_3, window_bounds = array<i64: 128, 128>}, {pipeline_mode = #tpu.pipeline_mode<synchronous>, transform_indices = @transform_4, window_bounds = array<i64: 1, 128>}, {pipeline_mode = #tpu.pipeline_mode<synchronous>, transform_indices = @transform_5, window_bounds = array<i64: 128, 128>}, {pipeline_mode = #tpu.pipeline_mode<synchronous>, transform_indices = @transform_6, window_bounds = array<i64: 1, 128>}, {pipeline_mode = #tpu.pipeline_mode<synchronous>, transform_indices = @transform_7, window_bounds = array<i64: 128, 256>}, {pipeline_mode = #tpu.pipeline_mode<synchronous>, transform_indices = @transform_8, window_bounds = array<i64: 1, 256>}, {transform_indices = @transform_9, window_bounds = array<i64: 128, 256>}]} {
    %c0 = arith.constant 0 : index
    %c0_0 = arith.constant 0 : index
    %0 = vector.load %arg1[%c0, %c0_0] : memref<128x256xf32, #tpu.memory_space<vmem>>, vector<128x256xf32>
    %1 = arith.truncf %0 : vector<128x256xf32> to vector<128x256xbf16>
    %c0_1 = arith.constant 0 : index
    %c0_2 = arith.constant 0 : index
    %2 = vector.load %arg2[%c0_1, %c0_2] : memref<256x128xbf16, #tpu.memory_space<vmem>>, vector<256x128xbf16>
    %cst = arith.constant dense<0.000000e+00> : vector<128x128xf32>
    %3 = tpu.matmul %1, %2, %cst {dimension_numbers = #tpu.dot_dimension_numbers<[1], [0], [0], [1], [0, 0, 1, 1], [], []>} : vector<128x256xbf16>, vector<256x128xbf16>, vector<128x128xf32> -> vector<128x128xf32>
    %c0_3 = arith.constant 0 : index
    %c0_4 = arith.constant 0 : index
    %4 = vector.load %arg3[%c0_3, %c0_4] : memref<1x128xf32, #tpu.memory_space<vmem>>, vector<1x128xf32>
    %5 = vector.broadcast %4 : vector<1x128xf32> to vector<128x128xf32>
    %6 = arith.addf %3, %5 : vector<128x128xf32>
    %cst_5 = arith.constant 0.000000e+00 : f32
    %7 = vector.broadcast %cst_5 : f32 to vector<128x128xf32>
    %8 = arith.maximumf %6, %7 : vector<128x128xf32>
    %9 = arith.truncf %8 : vector<128x128xf32> to vector<128x128xbf16>
    %c0_6 = arith.constant 0 : index
    %c0_7 = arith.constant 0 : index
    %10 = vector.load %arg4[%c0_6, %c0_7] : memref<128x128xbf16, #tpu.memory_space<vmem>>, vector<128x128xbf16>
    %cst_8 = arith.constant dense<0.000000e+00> : vector<128x128xf32>
    %11 = tpu.matmul %9, %10, %cst_8 {dimension_numbers = #tpu.dot_dimension_numbers<[1], [0], [0], [1], [0, 0, 1, 1], [], []>} : vector<128x128xbf16>, vector<128x128xbf16>, vector<128x128xf32> -> vector<128x128xf32>
    %c0_9 = arith.constant 0 : index
    %c0_10 = arith.constant 0 : index
    %12 = vector.load %arg5[%c0_9, %c0_10] : memref<1x128xf32, #tpu.memory_space<vmem>>, vector<1x128xf32>
    %13 = vector.broadcast %12 : vector<1x128xf32> to vector<128x128xf32>
    %14 = arith.addf %11, %13 : vector<128x128xf32>
    %cst_11 = arith.constant 0.000000e+00 : f32
    %15 = vector.broadcast %cst_11 : f32 to vector<128x128xf32>
    %16 = arith.maximumf %14, %15 : vector<128x128xf32>
    %17 = arith.truncf %16 : vector<128x128xf32> to vector<128x128xbf16>
    %c0_12 = arith.constant 0 : index
    %c0_13 = arith.constant 0 : index
    %18 = vector.load %arg6[%c0_12, %c0_13] : memref<128x128xbf16, #tpu.memory_space<vmem>>, vector<128x128xbf16>
    %cst_14 = arith.constant dense<0.000000e+00> : vector<128x128xf32>
    %19 = tpu.matmul %17, %18, %cst_14 {dimension_numbers = #tpu.dot_dimension_numbers<[1], [0], [0], [1], [0, 0, 1, 1], [], []>} : vector<128x128xbf16>, vector<128x128xbf16>, vector<128x128xf32> -> vector<128x128xf32>
    %c0_15 = arith.constant 0 : index
    %c0_16 = arith.constant 0 : index
    %20 = vector.load %arg7[%c0_15, %c0_16] : memref<1x128xf32, #tpu.memory_space<vmem>>, vector<1x128xf32>
    %21 = vector.broadcast %20 : vector<1x128xf32> to vector<128x128xf32>
    %22 = arith.addf %19, %21 : vector<128x128xf32>
    %cst_17 = arith.constant 0.000000e+00 : f32
    %23 = vector.broadcast %cst_17 : f32 to vector<128x128xf32>
    %24 = arith.maximumf %22, %23 : vector<128x128xf32>
    %25 = arith.truncf %24 : vector<128x128xf32> to vector<128x128xbf16>
    %c0_18 = arith.constant 0 : index
    %c0_19 = arith.constant 0 : index
    %26 = vector.load %arg8[%c0_18, %c0_19] : memref<128x256xbf16, #tpu.memory_space<vmem>>, vector<128x256xbf16>
    %cst_20 = arith.constant dense<0.000000e+00> : vector<128x256xf32>
    %27 = tpu.matmul %25, %26, %cst_20 {dimension_numbers = #tpu.dot_dimension_numbers<[1], [0], [0], [1], [0, 0, 1, 1], [], []>} : vector<128x128xbf16>, vector<128x256xbf16>, vector<128x256xf32> -> vector<128x256xf32>
    %c0_21 = arith.constant 0 : index
    %c0_22 = arith.constant 0 : index
    %28 = vector.load %arg9[%c0_21, %c0_22] : memref<1x256xf32, #tpu.memory_space<vmem>>, vector<1x256xf32>
    %29 = vector.broadcast %28 : vector<1x256xf32> to vector<128x256xf32>
    %30 = arith.addf %27, %29 : vector<128x256xf32>
    %31 = arith.negf %30 : vector<128x256xf32>
    %32 = math.exp %31 : vector<128x256xf32>
    %cst_23 = arith.constant 1.000000e+00 : f32
    %33 = vector.broadcast %cst_23 : f32 to vector<128x256xf32>
    %34 = arith.addf %33, %32 : vector<128x256xf32>
    %35 = arith.divf %33, %34 : vector<128x256xf32>
    %36 = arith.truncf %35 : vector<128x256xf32> to vector<128x256xbf16>
    %c0_24 = arith.constant 0 : index
    %c0_25 = arith.constant 0 : index
    %37 = vector.load %arg10[%c0_24, %c0_25] : memref<128x256xbf16, #tpu.memory_space<vmem>>, vector<128x256xbf16>
    tpu.vector_store %arg10[%c0_24, %c0_25], %36 {strides = array<i32>} : memref<128x256xbf16, #tpu.memory_space<vmem>>, vector<128x256xbf16>,
    return
  }
  func.func @transform_0(%arg0: i32) -> (i32, i32) {
    %c0_i32 = arith.constant 0 : i32
    %c0_i32_0 = arith.constant 0 : i32
    return %arg0, %c0_i32 : i32, i32
  }
  func.func @transform_1(%arg0: i32) -> (i32, i32) {
    %c0_i32 = arith.constant 0 : i32
    %c0_i32_0 = arith.constant 0 : i32
    %c0_i32_1 = arith.constant 0 : i32
    return %c0_i32, %c0_i32_0 : i32, i32
  }
  func.func @transform_2(%arg0: i32) -> (i32, i32) {
    %c0_i32 = arith.constant 0 : i32
    %c0_i32_0 = arith.constant 0 : i32
    %c0_i32_1 = arith.constant 0 : i32
    return %c0_i32, %c0_i32_0 : i32, i32
  }
  func.func @transform_3(%arg0: i32) -> (i32, i32) {
    %c0_i32 = arith.constant 0 : i32
    %c0_i32_0 = arith.constant 0 : i32
    %c0_i32_1 = arith.constant 0 : i32
    return %c0_i32, %c0_i32_0 : i32, i32
  }
  func.func @transform_4(%arg0: i32) -> (i32, i32) {
    %c0_i32 = arith.constant 0 : i32
    %c0_i32_0 = arith.constant 0 : i32
    %c0_i32_1 = arith.constant 0 : i32
    return %c0_i32, %c0_i32_0 : i32, i32
  }
  func.func @transform_5(%arg0: i32) -> (i32, i32) {
    %c0_i32 = arith.constant 0 : i32
    %c0_i32_0 = arith.constant 0 : i32
    %c0_i32_1 = arith.constant 0 : i32
    return %c0_i32, %c0_i32_0 : i32, i32
  }
  func.func @transform_6(%arg0: i32) -> (i32, i32) {
    %c0_i32 = arith.constant 0 : i32
    %c0_i32_0 = arith.constant 0 : i32
    %c0_i32_1 = arith.constant 0 : i32
    return %c0_i32, %c0_i32_0 : i32, i32
  }
  func.func @transform_7(%arg0: i32) -> (i32, i32) {
    %c0_i32 = arith.constant 0 : i32
    %c0_i32_0 = arith.constant 0 : i32
    %c0_i32_1 = arith.constant 0 : i32
    return %c0_i32, %c0_i32_0 : i32, i32
  }
  func.func @transform_8(%arg0: i32) -> (i32, i32) {
    %c0_i32 = arith.constant 0 : i32
    %c0_i32_0 = arith.constant 0 : i32
    %c0_i32_1 = arith.constant 0 : i32
    return %c0_i32, %c0_i32_0 : i32, i32
  }
  func.func @transform_9(%arg0: i32) -> (i32, i32) {
    %c0_i32 = arith.constant 0 : i32
    %c0_i32_0 = arith.constant 0 : i32
    return %arg0, %c0_i32 : i32, i32
  }
}

</mosaic_0001>

<bundles_post_ra>
// kernel: autoencoder_forward.1
= control target key start
LH: loop header
LB: loop body
LE: loop exit
PB: predicated region body
PF: predicated region fallthrough
CT: control target
= control target key end

     0   :  { %14 = vsyncpa [#allocation3], 0  ;;  %s2664_s0 = inlined_call_operand.vmem [shape: f32[512,256], index: 0, kind: input, shape index: {}]   ;;  %s2665_s1 = inlined_call_operand.vmem [shape: bf16[256,128], index: 1, kind: input, shape index: {}]   ;;  %s2666_s2 = inlined_call_operand.vmem [shape: f32[1,128], index: 2, kind: input, shape index: {}]   ;;  %s2667_s3 = inlined_call_operand.vmem [shape: bf16[128,128], index: 3, kind: input, shape index: {}]   ;;  %s2668_s4 = inlined_call_operand.vmem [shape: f32[1,128], index: 4, kind: input, shape index: {}]   ;;  %s2669_s5 = inlined_call_operand.vmem [shape: bf16[128,128], index: 5, kind: input, shape index: {}]   ;;  %s2670_s6 = inlined_call_operand.vmem [shape: f32[1,128], index: 6, kind: input, shape index: {}]   ;;  %s2671_s7 = inlined_call_operand.vmem [shape: bf16[128,256], index: 7, kind: input, shape index: {}]   ;;  %s2672_s8 = inlined_call_operand.vmem [shape: f32[1,256], index: 8, kind: input, shape index: {}]   ;;  %s2673_s9 = inlined_call_operand.hbm [shape: bf16[512,256], index: 9, kind: output, shape index: {}]  }
   0x1   :  { %16 = vsyncpa [#allocation3 + $0x1], 0  ;;  %s2280_s30 = smov 0   ;;  %s2282_s10 = smov 0  }
   0x2   :  { %s2284_s11 = smov 0   ;;  %s2286_s12 = smov 0  }
   0x3 LB: > { %s2301_s13 = sadd.s32 4294967295, %s2224_s12   ;;  %s1628_s14 = sadd.s32 4294967294, %s2224_s12   ;;  %s2224_s12 = sphi %s2286_s12, %s2679_s12   ;;  %s2220_s11 = sphi %s2284_s11, %s2678_s11   ;;  %s2216_s10 = sphi %s2282_s10, %s2677_s10   ;;  %s2212_s30 = sphi %s2280_s30, %s2676_s30  }
   0x4   : > { %s2305_s15 = sadd.s32 1, %s2224_s12   ;;  %s223_s16 = sadd.s32 1, %s2220_s11 }
   0x5   : > { %s220_s17 = ssub.s32 %s2224_s12, %s2305_s15  ;;  %p233_p0 = scmp.ne.s32.totalorder %s2220_s11, %s2216_s10 }
   0x6   : > { %p221_p1 = scmp.eq.s32.totalorder %s220_s17, 0  ;;  %p234_p2 = scmp.eq.s32.totalorder %s2301_s13, 3 }
   0x7   : > { %p239_p3 = scmp.ne.s32.totalorder %s2216_s10, %s2212_s30  ;;  %p240_p4 = scmp.eq.s32.totalorder %s1628_s14, 3 }
   0x8   : > { %s2316_s18 = scalar_select %p221_p1, %s2220_s11, %s223_s16  }
   0x9   : > { %p2318_p5 = por %p234_p2, %p233_p0  ;;  %p2322_p6 = por %p240_p4, %p239_p3 }
   0xa   : > { %p1631_p7 = scmp.ge.s32.totalorder %s2224_s12, 1  ;;  %p292_p8 = scmp.lt.s32.totalorder %s2224_s12, 5 }
   0xc   : > { %p293_p9 = pnand %p1631_p7, %p292_p8 }
   0xd   : > { %v1978_v0 = vld [vmem:[%s2665_s1 + $0x40] sm:$0xff] (!%p293_p9)   ;;  %s1633_s23 = sshll.u32 (!%p293_p9), %s2301_s13, 4  ;;  %v1980_v2 = vld [vmem:[%s2665_s1 + $0x48] sm:$0xff] (!%p293_p9)   ;;  %v1982_v4 = vld [vmem:[%s2665_s1 + $0x50] sm:$0xff] (!%p293_p9)   ;;  %s1759_s27 = sshll.u32 (!%p293_p9), %s2301_s13, 11 }
   0xe   : > { %296 = sbr.rel (%p293_p9) target bundleno = 1039 (0x40f), region = 56  ;;  %v1979_v1 = vld [vmem:[%s2665_s1] sm:$0xff] (!%p293_p9)   ;;  %1760 = vmatprep.subr.bf16.mxu0 (!%p293_p9), %v1978_v0  ;;  %1920 = vmatprep.subr.bf16.mxu1 (!%p293_p9), %v1978_v0  ;;  %p330_p10 = scmp.lt.s32.totalorder (!%p293_p9), %s1633_s23, 63  ;;  %v1981_v3 = vld [vmem:[%s2665_s1 + $0x8] sm:$0xff] (!%p293_p9)   ;;  %v1983_v5 = vld [vmem:[%s2665_s1 + $0x10] sm:$0xff] (!%p293_p9)  }
   0xf   : > { %1761 = vmatpush3.bf16.msra.mxu0 (!%p293_p9), %v1979_v1  ;;  %1928 = vmatpush3.bf16.msra.mxu1 (!%p293_p9), %v1979_v1  ;;  %v1984_v6 = vld [vmem:[%s2665_s1 + $0x58] sm:$0xff] (!%p293_p9)   ;;  %v1986_v8 = vld [vmem:[%s2665_s1 + $0x60] sm:$0xff] (!%p293_p9)   ;;  %v1988_v10 = vld [vmem:[%s2665_s1 + $0x68] sm:$0xff] (!%p293_p9)   ;;  %s2615_s16 = scalar_lea.hbm (!%p293_p9), %s2673_s9, %s1759_s27  ;;  %s2227_s21 = smov (!%p293_p9), [#allocation2]  }
  0x10   : > { %1762 = vmatprep.subr.bf16.mxu0 (!%p293_p9), %v1980_v2  ;;  %1921 = vmatprep.subr.bf16.mxu1 (!%p293_p9), %v1980_v2  ;;  %v1985_v7 = vld [vmem:[%s2665_s1 + $0x18] sm:$0xff] (!%p293_p9)   ;;  %v1987_v9 = vld [vmem:[%s2665_s1 + $0x20] sm:$0xff] (!%p293_p9)   ;;  %v1989_v14 = vld [vmem:[%s2665_s1 + $0x28] sm:$0xff] (!%p293_p9)   ;;  %s2166_s22 = sshll.u32 (!%p293_p9), %s2227_s21, 4  ;;  %s2167_s22 = int_to_ptr.vmem [resolvable:$false] %s2166_s22 }
  0x11   : > { %v1990_v15 = vld [vmem:[%s2665_s1 + $0x70] sm:$0xff] (!%p293_p9)   ;;  %v1992_v20 = vld [vmem:[%s2665_s1 + $0x78] sm:$0xff] (!%p293_p9)   ;;  %v1994_v30 = vld [vmem:[%s2667_s3] sm:$0xff] (!%p293_p9)   ;;  %s2168_s24 = scalar_lea.vmem (!%p293_p9), %s2167_s22, 4096 }
  0x12   : > { %v1991_v19 = vld [vmem:[%s2665_s1 + $0x30] sm:$0xff] (!%p293_p9)   ;;  %v1993_v21 = vld [vmem:[%s2665_s1 + $0x38] sm:$0xff] (!%p293_p9)   ;;  %v1995_v34 = vld [vmem:[%s2667_s3 + $0x8] sm:$0xff] (!%p293_p9)  }
  0x13   : > { %1763 = vmatpush3.bf16.msra.mxu0 (!%p293_p9), %v1981_v3  ;;  %1929 = vmatpush3.bf16.msra.mxu1 (!%p293_p9), %v1981_v3  ;;  %v1996_v44 = vld [vmem:[%s2667_s3 + $0x10] sm:$0xff] (!%p293_p9)   ;;  %v1997_v48 = vld [vmem:[%s2667_s3 + $0x18] sm:$0xff] (!%p293_p9)  }
  0x14   : > { %1764 = vmatprep.subr.bf16.mxu0 (!%p293_p9), %v1982_v4  ;;  %1922 = vmatprep.subr.bf16.mxu1 (!%p293_p9), %v1982_v4  ;;  %v1998_v4 = vld [vmem:[%s2667_s3 + $0x20] sm:$0xff] (!%p293_p9)  }
  0x15   : > { %s2681_s23 = smov (!%p330_p10, %s1633_s23), 63 }
  0x16   : > { %s1741_s25 = sshll.u32 %s2681_s23, 4 }
  0x17   : > { %1765 = vmatpush3.bf16.msra.mxu0 %v1983_v5  ;;  %1930 = vmatpush3.bf16.msra.mxu1 %v1983_v5  ;;  %s2359_s17 = scalar_lea.vmem %s2664_s0, %s1741_s25  ;;  %v1999_v5 = vld [vmem:[%s2667_s3 + $0x28] sm:$0xff]   ;;  %s326_s25 = sand.u32 1, %s2216_s10  }
  0x18   : > { %1766 = vmatprep.subr.bf16.mxu0 %v1984_v6  ;;  %1923 = vmatprep.subr.bf16.mxu1 %v1984_v6  ;;  %v339_v11 = vld [vmem:[%s2359_s17 + $0x8] sm:$0xff]  ;;  %v341_v12 = vld [vmem:[%s2359_s17 + $0x18] sm:$0xff]  ;;  %v338_v22 = vld [vmem:[%s2359_s17] sm:$0xff]  ;;  %s1632_s26 = sshll.u32 %s326_s25, 7  ;;  %s2623_s13 = scalar_lea.sflag [#allocation3], %s326_s25 }
  0x19   : > { %v371_v13 = vpack.c.bf16 %v341_v12, %v339_v11  ;;  %v355_v16 = vld [vmem:[%s2359_s17 + $0x88] sm:$0xff]  ;;  %v357_v17 = vld [vmem:[%s2359_s17 + $0x98] sm:$0xff]  ;;  %v340_v23 = vld [vmem:[%s2359_s17 + $0x10] sm:$0xff] }
  0x1a   : > { %v379_v18 = vpack.c.bf16 %v357_v17, %v355_v16  ;;  %v343_v24 = vld [vmem:[%s2359_s17 + $0x28] sm:$0xff]  ;;  %v345_v25 = vld [vmem:[%s2359_s17 + $0x38] sm:$0xff]  ;;  %v354_v26 = vld [vmem:[%s2359_s17 + $0x80] sm:$0xff]  ;;  %v370_v31 = vpack.c.bf16 %v340_v23, %v338_v22 }
  0x1b   : > { %1767 = vmatpush3.bf16.msra.mxu0 %v1985_v7  ;;  %1931 = vmatpush3.bf16.msra.mxu1 %v1985_v7  ;;  %v356_v27 = vld [vmem:[%s2359_s17 + $0x90] sm:$0xff]  ;;  %v359_v28 = vld [vmem:[%s2359_s17 + $0xa8] sm:$0xff]  ;;  %v361_v29 = vld [vmem:[%s2359_s17 + $0xb8] sm:$0xff]  ;;  %v373_v32 = vpack.c.bf16 %v345_v25, %v343_v24 }
  0x1c   : > { %1768 = vmatprep.subr.bf16.mxu0 %v1986_v8  ;;  %1924 = vmatprep.subr.bf16.mxu1 %v1986_v8  ;;  %v378_v33 = vpack.c.bf16 %v356_v27, %v354_v26  ;;  %v381_v35 = vpack.c.bf16 %v361_v29, %v359_v28  ;;  %v342_v36 = vld [vmem:[%s2359_s17 + $0x20] sm:$0xff]  ;;  %v344_v37 = vld [vmem:[%s2359_s17 + $0x30] sm:$0xff]  ;;  %v347_v38 = vld [vmem:[%s2359_s17 + $0x48] sm:$0xff] }
  0x1d   : > { %553 = vmatprep.mubr.bf16.mxu0 %v371_v13  ;;  %585 = vmatprep.mubr.bf16.mxu1 %v379_v18  ;;  %v349_v39 = vld [vmem:[%s2359_s17 + $0x58] sm:$0xff]  ;;  %v358_v40 = vld [vmem:[%s2359_s17 + $0xa0] sm:$0xff]  ;;  %v360_v41 = vld [vmem:[%s2359_s17 + $0xb0] sm:$0xff]  ;;  %v372_v45 = vpack.c.bf16 %v344_v37, %v342_v36 }
  0x1e   : > { %v363_v42 = vld [vmem:[%s2359_s17 + $0xc8] sm:$0xff]  ;;  %v365_v43 = vld [vmem:[%s2359_s17 + $0xd8] sm:$0xff]  ;;  %v375_v46 = vpack.c.bf16 %v349_v39, %v347_v38  ;;  %v380_v47 = vpack.c.bf16 %v360_v41, %v358_v40  ;;  %v346_v50 = vld [vmem:[%s2359_s17 + $0x40] sm:$0xff] }
  0x1f   : > { %1769 = vmatpush3.bf16.msra.mxu0 %v1987_v9  ;;  %1932 = vmatpush3.bf16.msra.mxu1 %v1987_v9  ;;  %v383_v49 = vpack.c.bf16 %v365_v43, %v363_v42  ;;  %v348_v51 = vld [vmem:[%s2359_s17 + $0x50] sm:$0xff]  ;;  %v351_v52 = vld [vmem:[%s2359_s17 + $0x68] sm:$0xff]  ;;  %v353_v53 = vld [vmem:[%s2359_s17 + $0x78] sm:$0xff] }
  0x20   : > { %1770 = vmatprep.subr.bf16.mxu0 %v1988_v10  ;;  %1925 = vmatprep.subr.bf16.mxu1 %v1988_v10  ;;  %v362_v54 = vld [vmem:[%s2359_s17 + $0xc0] sm:$0xff]  ;;  %v364_v55 = vld [vmem:[%s2359_s17 + $0xd0] sm:$0xff]  ;;  %v367_v56 = vld [vmem:[%s2359_s17 + $0xe8] sm:$0xff]  ;;  %v374_v58 = vpack.c.bf16 %v348_v51, %v346_v50  ;;  %v377_v59 = vpack.c.bf16 %v353_v53, %v351_v52 }
  0x21   : > { %v369_v57 = vld [vmem:[%s2359_s17 + $0xf8] sm:$0xff]  ;;  %v382_v60 = vpack.c.bf16 %v364_v55, %v362_v54  ;;  %v350_v62 = vld [vmem:[%s2359_s17 + $0x60] sm:$0xff]  ;;  %v352_v63 = vld [vmem:[%s2359_s17 + $0x70] sm:$0xff] }
  0x22   : > { %v385_v61 = vpack.c.bf16 %v369_v57, %v367_v56  ;;  %v366_v0 = vld [vmem:[%s2359_s17 + $0xe0] sm:$0xff]  ;;  %v368_v1 = vld [vmem:[%s2359_s17 + $0xf0] sm:$0xff]  ;;  %v376_v2 = vpack.c.bf16 %v352_v63, %v350_v62  ;;  %v2001_v7 = vld [vmem:[%s2667_s3 + $0x38] sm:$0xff]   ;;  %s2578_s17 = scalar_lea.vmem [#allocation2], %s1632_s26 }
  0x23   : > { %1771 = vmatpush3.bf16.msra.mxu0 %v1989_v14  ;;  %1933 = vmatpush3.bf16.msra.mxu1 %v1989_v14  ;;  %v384_v3 = vpack.c.bf16 %v368_v1, %v366_v0  ;;  %v2000_v6 = vld [vmem:[%s2667_s3 + $0x30] sm:$0xff]   ;;  %v2441_v8 = vld [vmem:[%s2669_s5] sm:$0xff]   ;;  %s1566_s28 = sshll.u32 %s2578_s17, 4  ;;  %s2617_s28 = int_to_ptr.vmem [resolvable:$true] %s1566_s28 }
  0x24   : > { %1772 = vmatprep.subr.bf16.mxu0 %v1990_v15  ;;  %1926 = vmatprep.subr.bf16.mxu1 %v1990_v15  ;;  %v2447_v10 = vld [vmem:[%s2666_s2] ss:$0 sm:$0xff]  ;;  %s2162_s23 = scalar_lea.vmem %s2617_s28, 2048  ;;  %p2169_p0 = scmp.lt.s32.totalorder %s2617_s28, %s2167_s22 }
  0x25   : > { %p2163_p11 = scmp.ne.s32.totalorder %s2617_s28, %s2162_s23  ;;  %p2170_p1 = scmp.lt.s32.totalorder %s2168_s24, %s2162_s23 }
  0x27   : > { %1773 = vmatpush3.bf16.msra.mxu0 %v1991_v19  ;;  %1934 = vmatpush3.bf16.msra.mxu1 %v1991_v19  ;;  %p2164_p12 = pnand %p2163_p11, %p2318_p5  ;;  %p2171_p2 = por %p2170_p1, %p2169_p0 }
  0x28   : > { %1774 = vmatprep.subr.bf16.mxu0 %v1992_v20  ;;  %1927 = vmatprep.subr.bf16.mxu1 %v1992_v20 }
  0x29   : > { %p2165_p13 = pneg %p2164_p12 }
  0x2b   : > { %1775 = vmatpush3.bf16.msra.mxu0 %v1993_v21  ;;  %1935 = vmatpush3.bf16.msra.mxu1 %v1993_v21  ;;  %p2172_p3 = pnand %p2171_p2, %p2165_p13 }
  0x2c   : > { %1856 = vmatprep.subr.bf16.mxu1 %v1994_v30 }
  0x2e   : > { %554 = vmatmul.mubr.bf16.vlgmr.msra.gmra.mrb[0].mxu0 %v370_v31  ;;  %586 = vmatmul.mubr.bf16.vlgmr.msra.gmra.mrb[0].mxu1 %v378_v33 }
  0x2f   : > { %561 = vmatprep.mubr.bf16.mxu0 %v373_v32  ;;  %593 = vmatprep.mubr.bf16.mxu1 %v381_v35 }
  0x30   : > { %1857 = vmatpush3.bf16.msra.mxu1 %v1994_v30 }
  0x31   : > { %1858 = vmatprep.subr.bf16.mxu1 %v1995_v34 }
  0x34   : > { %1859 = vmatpush3.bf16.msra.mxu1 %v1995_v34 }
  0x35   : > { %1860 = vmatprep.subr.bf16.mxu1 %v1996_v44 }
  0x36   : > { %562 = vmatmul.mubr.bf16.gmra.mrb[4].mxu0 %v372_v45  ;;  %594 = vmatmul.mubr.bf16.gmra.mrb[4].mxu1 %v380_v47 }
  0x37   : > { %569 = vmatprep.mubr.bf16.mxu0 %v375_v46  ;;  %601 = vmatprep.mubr.bf16.mxu1 %v383_v49 }
  0x38   : > { %1861 = vmatpush3.bf16.msra.mxu1 %v1996_v44 }
  0x39   : > { %1862 = vmatprep.subr.bf16.mxu1 %v1997_v48 }
  0x3c   : > { %1863 = vmatpush3.bf16.msra.mxu1 %v1997_v48 }
  0x3d   : > { %1864 = vmatprep.subr.bf16.mxu1 %v1998_v4 }
  0x3e   : > { %570 = vmatmul.mubr.bf16.gmra.mrb[8].mxu0 %v374_v58  ;;  %602 = vmatmul.mubr.bf16.gmra.mrb[8].mxu1 %v382_v60 }
  0x3f   : > { %577 = vmatprep.mubr.bf16.mxu0 %v377_v59  ;;  %609 = vmatprep.mubr.bf16.mxu1 %v385_v61  ;;  %v2003_v59 = vld [vmem:[%s2669_s5 + $0x8] sm:$0xff]  }
  0x40   : > { %1865 = vmatpush3.bf16.msra.mxu1 %v1998_v4 }
  0x41   : > { %1866 = vmatprep.subr.bf16.mxu1 %v1999_v5 }
  0x44   : > { %1867 = vmatpush3.bf16.msra.mxu1 %v1999_v5 }
  0x45   : > { %1868 = vmatprep.subr.bf16.mxu1 %v2000_v6 }
  0x46   : > { %578 = vmatmul.mubr.bf16.gmra.mrb[12].mxu0 %v376_v2  ;;  %610 = vmatmul.mubr.bf16.gmra.mrb[12].mxu1 %v384_v3 }
  0x48   : > { %1869 = vmatpush3.bf16.msra.mxu1 %v2000_v6  ;;  %v2004_v6 = vld [vmem:[%s2669_s5 + $0x10] sm:$0xff]  }
  0x49   : > { %1870 = vmatprep.subr.bf16.mxu1 %v2001_v7 }
  0x4c   : > { %1871 = vmatpush3.bf16.msra.mxu1 %v2001_v7 }
  0x4d   : > { %1888 = vmatprep.subr.bf16.mxu1 %v2441_v8 }
 0x101   : > { %v1776_v9 = vpop.f32.mrb[0].mxu0  ;;  %v1800_v12 = vpop.f32.mrb[0].mxu1 }
 0x102   : > { %v1777_v11 = vpop.f32.mrb[1].mxu0  ;;  %v1801_v15 = vpop.f32.mrb[1].mxu1 }
 0x103   : > { %v1778_v13 = vadd.f32 %v1777_v11, %v1776_v9  ;;  %v1779_v14 = vpop.f32.mrb[2].mxu0  ;;  %v1802_v17 = vadd.f32 %v1801_v15, %v1800_v12  ;;  %v1803_v18 = vpop.f32.mrb[2].mxu1 }
 0x104   : > { %v1780_v16 = vpop.f32.mrb[3].mxu0  ;;  %v1804_v21 = vpop.f32.mrb[3].mxu1 }
 0x105   : > { %v556_v19 = vadd.f32 %v1778_v13, %v2447_v10  ;;  %v1781_v20 = vadd.f32 %v1780_v16, %v1779_v14  ;;  %v588_v22 = vadd.f32 %v1802_v17, %v2447_v10  ;;  %v1805_v23 = vadd.f32 %v1804_v21, %v1803_v18 }
 0x107   : > { %v559_v24 = vadd.f32 %v1781_v20, %v2447_v10  ;;  %v626_v25 = vmax.f32 %v588_v22, 0.0  ;;  %v591_v26 = vadd.f32 %v1805_v23, %v2447_v10  ;;  %v618_v27 = vmax.f32 %v556_v19, 0.0  ;;  %v2005_v20 = vld [vmem:[%s2669_s5 + $0x18] sm:$0xff]  }
 0x109   : > { %v619_v28 = vmax.f32 %v559_v24, 0.0  ;;  %v1782_v29 = vpop.f32.mrb[4].mxu0  ;;  %v627_v31 = vmax.f32 %v591_v26, 0.0  ;;  %v1806_v32 = vpop.f32.mrb[4].mxu1 }
 0x10a   : > { %v1783_v30 = vpop.f32.mrb[5].mxu0  ;;  %v1807_v36 = vpop.f32.mrb[5].mxu1 }
 0x10b   : > { %v1784_v33 = vadd.f32 %v1783_v30, %v1782_v29  ;;  %v1785_v34 = vpop.f32.mrb[6].mxu0  ;;  %v634_v35 = vpack.c.bf16 %v619_v28, %v618_v27  ;;  %v1808_v38 = vadd.f32 %v1807_v36, %v1806_v32  ;;  %v1809_v39 = vpop.f32.mrb[6].mxu1  ;;  %v2453_v40 = vpack.c.bf16 %v627_v31, %v626_v25  ;;  %v2006_v31 = vld [vmem:[%s2669_s5 + $0x20] sm:$0xff]  }
 0x10c   : > { %v1786_v37 = vpop.f32.mrb[7].mxu0  ;;  %v1810_v43 = vpop.f32.mrb[7].mxu1 }
 0x10d   : > { %v564_v41 = vadd.f32 %v1784_v33, %v2447_v10  ;;  %v1787_v42 = vadd.f32 %v1786_v37, %v1785_v34  ;;  %1872 = vmatprep.mubr.bf16.mxu1 %v634_v35  ;;  %v596_v44 = vadd.f32 %v1808_v38, %v2447_v10  ;;  %v1811_v45 = vadd.f32 %v1810_v43, %v1809_v39  ;;  %v2007_v38 = vld [vmem:[%s2669_s5 + $0x28] sm:$0xff]   ;;  %v2015_v43 = vld [vmem:[%s2671_s7 + $0x14] ss:$8 sps:$4 sm:$0xff]  }
 0x10f   : > { %v567_v46 = vadd.f32 %v1787_v42, %v2447_v10  ;;  %v628_v47 = vmax.f32 %v596_v44, 0.0  ;;  %v599_v48 = vadd.f32 %v1811_v45, %v2447_v10  ;;  %v620_v49 = vmax.f32 %v564_v41, 0.0  ;;  %v2009_v41 = vld [vmem:[%s2669_s5 + $0x38] sm:$0xff]   ;;  %v2012_v42 = vld [vmem:[%s2671_s7 + $0x4] ss:$8 sps:$4 sm:$0xff]  }
 0x110   : > { %1134 = vmatprep.subr.bf16.mxu0 %v2012_v42  ;;  %v2013_v44 = vld [vmem:[%s2671_s7 + $0x10] ss:$8 sps:$4 sm:$0xff]   ;;  %v2018_v45 = vld [vmem:[%s2671_s7 + $0x24] ss:$8 sps:$4 sm:$0xff]  }
 0x111   : > { %v621_v50 = vmax.f32 %v567_v46, 0.0  ;;  %v1788_v51 = vpop.f32.mrb[8].mxu0  ;;  %v629_v53 = vmax.f32 %v599_v48, 0.0  ;;  %v1812_v54 = vpop.f32.mrb[8].mxu1  ;;  %v2016_v46 = vld [vmem:[%s2671_s7 + $0x20] ss:$8 sps:$4 sm:$0xff]  }
 0x112   : > { %v1789_v52 = vpop.f32.mrb[9].mxu0  ;;  %v1813_v58 = vpop.f32.mrb[9].mxu1  ;;  %v2019_v48 = vld [vmem:[%s2671_s7 + $0x30] ss:$8 sps:$4 sm:$0xff]  }
 0x113   : > { %v635_v55 = vpack.c.bf16 %v621_v50, %v620_v49  ;;  %v1790_v56 = vadd.f32 %v1789_v52, %v1788_v51  ;;  %v1791_v57 = vpop.f32.mrb[10].mxu0  ;;  %v1814_v61 = vadd.f32 %v1813_v58, %v1812_v54  ;;  %v1815_v62 = vpop.f32.mrb[10].mxu1  ;;  %v639_v63 = vpack.c.bf16 %v629_v53, %v628_v47  ;;  %v2021_v47 = vld [vmem:[%s2671_s7 + $0x34] ss:$8 sps:$4 sm:$0xff]   ;;  %v2024_v49 = vld [vmem:[%s2671_s7 + $0x44] ss:$8 sps:$4 sm:$0xff]  }
 0x114   : > { %v1792_v60 = vpop.f32.mrb[11].mxu0  ;;  %v1816_v2 = vpop.f32.mrb[11].mxu1  ;;  %v2022_v50 = vld [vmem:[%s2671_s7 + $0x40] ss:$8 sps:$4 sm:$0xff]   ;;  %v2027_v51 = vld [vmem:[%s2671_s7 + $0x54] ss:$8 sps:$4 sm:$0xff]  }
 0x115   : > { %v572_v0 = vadd.f32 %v1790_v56, %v2447_v10  ;;  %v1793_v1 = vadd.f32 %v1792_v60, %v1791_v57  ;;  %1873 = vmatmul.mubr.bf16.vlgmr.msra.gmra.mrb[16].mxu1 %v635_v55  ;;  %v604_v3 = vadd.f32 %v1814_v61, %v2447_v10  ;;  %v1817_v4 = vadd.f32 %v1816_v2, %v1815_v62  ;;  %v2025_v52 = vld [vmem:[%s2671_s7 + $0x50] ss:$8 sps:$4 sm:$0xff]   ;;  %v1653_v53 = vld [vmem:[%s2668_s4] ss:$0 sm:$0xff] }
 0x116   : > { %1889 = vmatpush3.bf16.msra.mxu1 %v2441_v8 }
 0x117   : > { %v575_v5 = vadd.f32 %v1793_v1, %v2447_v10  ;;  %1890 = vmatprep.subr.bf16.mxu1 %v2003_v59  ;;  %v630_v7 = vmax.f32 %v604_v3, 0.0  ;;  %v607_v9 = vadd.f32 %v1817_v4, %v2447_v10  ;;  %v622_v11 = vmax.f32 %v572_v0, 0.0 }
 0x119   : > { %v623_v12 = vmax.f32 %v575_v5, 0.0  ;;  %v1794_v13 = vpop.f32.mrb[12].mxu0  ;;  %v631_v15 = vmax.f32 %v607_v9, 0.0  ;;  %v1818_v16 = vpop.f32.mrb[12].mxu1 }
 0x11a   : > { %v1795_v14 = vpop.f32.mrb[13].mxu0  ;;  %1891 = vmatpush3.bf16.msra.mxu1 %v2003_v59  ;;  %v1819_v19 = vpop.f32.mrb[13].mxu1 }
 0x11b   : > { %v1796_v17 = vadd.f32 %v1795_v14, %v1794_v13  ;;  %v1797_v18 = vpop.f32.mrb[14].mxu0  ;;  %v636_v8 = vpack.c.bf16 %v623_v12, %v622_v11  ;;  %1892 = vmatprep.subr.bf16.mxu1 %v2004_v6  ;;  %v1820_v22 = vadd.f32 %v1819_v19, %v1818_v16  ;;  %v1821_v23 = vpop.f32.mrb[14].mxu1  ;;  %v640_v24 = vpack.c.bf16 %v631_v15, %v630_v7 }
 0x11c   : > { %v1798_v21 = vpop.f32.mrb[15].mxu0  ;;  %v1822_v27 = vpop.f32.mrb[15].mxu1 }
 0x11d   : > { %v580_v25 = vadd.f32 %v1796_v17, %v2447_v10  ;;  %v1799_v26 = vadd.f32 %v1798_v21, %v1797_v18  ;;  %1876 = vmatprep.mubr.bf16.mxu1 %v636_v8  ;;  %v612_v28 = vadd.f32 %v1820_v22, %v2447_v10  ;;  %v1823_v29 = vadd.f32 %v1822_v27, %v1821_v23 }
 0x11e   : > { %1893 = vmatpush3.bf16.msra.mxu1 %v2004_v6 }
 0x11f   : > { %v583_v30 = vadd.f32 %v1799_v26, %v2447_v10  ;;  %1894 = vmatprep.subr.bf16.mxu1 %v2005_v20  ;;  %v632_v32 = vmax.f32 %v612_v28, 0.0  ;;  %v615_v33 = vadd.f32 %v1823_v29, %v2447_v10  ;;  %v624_v34 = vmax.f32 %v580_v25, 0.0  ;;  %v2008_v10 = vld [vmem:[%s2669_s5 + $0x30] sm:$0xff]  }
 0x121   : > { %v625_v35 = vmax.f32 %v583_v30, 0.0  ;;  %v633_v36 = vmax.f32 %v615_v33, 0.0 }
 0x122   : > { %1895 = vmatpush3.bf16.msra.mxu1 %v2005_v20 }
 0x123   : > { %v637_v37 = vpack.c.bf16 %v625_v35, %v624_v34  ;;  %1896 = vmatprep.subr.bf16.mxu1 %v2006_v31  ;;  %v641_v39 = vpack.c.bf16 %v633_v36, %v632_v32 }
 0x125   : > { %1877 = vmatmul.mubr.bf16.gmra.mrb[20].mxu1 %v637_v37 }
 0x126   : > { %1880 = vmatprep.mubr.bf16.mxu1 %v2453_v40  ;;  %1897 = vmatpush3.bf16.msra.mxu1 %v2006_v31  ;;  %v2010_v40 = vld [vmem:[%s2671_s7] ss:$8 sps:$4 sm:$0xff]  }
 0x127   : > { %1898 = vmatprep.subr.bf16.mxu1 %v2007_v38  ;;  %1135 = vmatpush1.bf16.msra.mxu0 %v2010_v40 }
 0x128   : > { %1136 = vmatprep.subr.bf16.mxu0 %v2015_v43 }
 0x12a   : > { %1899 = vmatpush3.bf16.msra.mxu1 %v2007_v38 }
 0x12b   : > { %1900 = vmatprep.subr.bf16.mxu1 %v2008_v10  ;;  %1137 = vmatpush1.bf16.msra.mxu0 %v2013_v44 }
 0x12c   : > { %1138 = vmatprep.subr.bf16.mxu0 %v2018_v45 }
 0x12d   : > { %1881 = vmatmul.mubr.bf16.gmra.mrb[24].mxu1 %v639_v63 }
 0x12e   : > { %1884 = vmatprep.mubr.bf16.mxu1 %v640_v24  ;;  %1901 = vmatpush3.bf16.msra.mxu1 %v2008_v10 }
 0x12f   : > { %1902 = vmatprep.subr.bf16.mxu1 %v2009_v41  ;;  %1139 = vmatpush1.bf16.msra.mxu0 %v2016_v46  ;;  %v2030_v46 = vld [vmem:[%s2671_s7 + $0x64] ss:$8 sps:$4 sm:$0xff]  }
 0x130   : > { %1140 = vmatprep.subr.bf16.mxu0 %v2021_v47  ;;  %v2028_v47 = vld [vmem:[%s2671_s7 + $0x60] ss:$8 sps:$4 sm:$0xff]  }
 0x132   : > { %1903 = vmatpush3.bf16.msra.mxu1 %v2009_v41 }
 0x133   : > { %1141 = vmatpush1.bf16.msra.mxu0 %v2019_v48  ;;  %v2033_v48 = vld [vmem:[%s2671_s7 + $0x74] ss:$8 sps:$4 sm:$0xff]  }
 0x134   : > { %1142 = vmatprep.subr.bf16.mxu0 %v2024_v49  ;;  %v2031_v49 = vld [vmem:[%s2671_s7 + $0x70] ss:$8 sps:$4 sm:$0xff]  }
 0x135   : > { %1885 = vmatmul.mubr.bf16.gmra.mrb[28].mxu1 %v641_v39 }
 0x137   : > { %1143 = vmatpush1.bf16.msra.mxu0 %v2022_v50  ;;  %v2226_v50 = vmov 0  }
 0x138   : > { %1144 = vmatprep.subr.bf16.mxu0 %v2027_v51  ;;  %1166 = vmatprep.mubr.bf16.mxu0 %v2226_v50  ;;  %v1662_v51 = vld [vmem:[%s2670_s6] ss:$0 sm:$0xff] }
 0x13b   : > { %1145 = vmatpush1.bf16.msra.mxu0 %v2025_v52 }
 0x13c   : > { %1146 = vmatprep.subr.bf16.mxu0 %v2030_v46 }
 0x13f   : > { %1147 = vmatpush1.bf16.msra.mxu0 %v2028_v47  ;;  %v1042_v47 = vld [vmem:[%s2672_s8] sm:$0x3] }
 0x140   : > { %1148 = vmatprep.subr.bf16.mxu0 %v2033_v48 }
 0x143   : > { %1149 = vmatpush1.bf16.msra.mxu0 %v2031_v49 }
 0x1e8   : > { %v1874_v54 = vpop.f32.mrb[16].mxu1 }
 0x1e9   : > { %v756_v55 = vadd.f32 %v1874_v54, %v1653_v53  ;;  %v747_v56 = vpop.f32.mrb[17].mxu1 }
 0x1ea   : > { %v748_v57 = vadd.f32 %v1653_v53, %v747_v56  ;;  %v1875_v58 = vpop.f32.mrb[18].mxu1 }
 0x1eb   : > { %v759_v59 = vadd.f32 %v1875_v58, %v1653_v53  ;;  %v750_v60 = vpop.f32.mrb[19].mxu1  ;;  %v812_v62 = vmax.f32 %v756_v55, 0.0 }
 0x1ec   : > { %v751_v61 = vadd.f32 %v1653_v53, %v750_v60  ;;  %v810_v0 = vmax.f32 %v748_v57, 0.0 }
 0x1ed   : > { %v813_v63 = vmax.f32 %v759_v59, 0.0 }
 0x1ee   : > { %v811_v1 = vmax.f32 %v751_v61, 0.0 }
 0x1ef   : > { %v827_v2 = vpack.c.bf16 %v813_v63, %v812_v62 }
 0x1f0   : > { %v826_v3 = vpack.c.bf16 %v811_v1, %v810_v0 }
 0x1f2   : > { %1904 = vmatprep.mubr.bf16.mxu1 %v826_v3 }
 0x1f3   : > { %1905 = vmatmul.mubr.bf16.vlgmr.msra.gmra.mrb[32].mxu1 %v827_v2 }
 0x1f8   : > { %v1878_v4 = vpop.f32.mrb[20].mxu1 }
 0x1f9   : > { %v772_v5 = vadd.f32 %v1878_v4, %v1653_v53  ;;  %v763_v6 = vpop.f32.mrb[21].mxu1 }
 0x1fa   : > { %v764_v7 = vadd.f32 %v1653_v53, %v763_v6  ;;  %v1879_v9 = vpop.f32.mrb[22].mxu1 }
 0x1fb   : > { %v775_v11 = vadd.f32 %v1879_v9, %v1653_v53  ;;  %v766_v12 = vpop.f32.mrb[23].mxu1  ;;  %v816_v14 = vmax.f32 %v772_v5, 0.0 }
 0x1fc   : > { %v767_v13 = vadd.f32 %v1653_v53, %v766_v12  ;;  %v814_v16 = vmax.f32 %v764_v7, 0.0 }
 0x1fd   : > { %v817_v15 = vmax.f32 %v775_v11, 0.0 }
 0x1fe   : > { %v815_v17 = vmax.f32 %v767_v13, 0.0 }
 0x1ff   : > { %v829_v18 = vpack.c.bf16 %v817_v15, %v816_v14 }
 0x200   : > { %v828_v8 = vpack.c.bf16 %v815_v17, %v814_v16  ;;  %v1882_v19 = vpop.f32.mrb[24].mxu1 }
 0x201   : > { %v788_v20 = vadd.f32 %v1882_v19, %v1653_v53  ;;  %v779_v21 = vpop.f32.mrb[25].mxu1 }
 0x202   : > { %v780_v22 = vadd.f32 %v1653_v53, %v779_v21  ;;  %v1883_v23 = vpop.f32.mrb[26].mxu1  ;;  %1908 = vmatprep.mubr.bf16.mxu1 %v828_v8 }
 0x203   : > { %v820_v24 = vmax.f32 %v788_v20, 0.0  ;;  %v791_v25 = vadd.f32 %v1883_v23, %v1653_v53  ;;  %v782_v26 = vpop.f32.mrb[27].mxu1  ;;  %1909 = vmatmul.mubr.bf16.gmra.mrb[36].mxu1 %v829_v18 }
 0x204   : > { %v818_v27 = vmax.f32 %v780_v22, 0.0  ;;  %v783_v28 = vadd.f32 %v1653_v53, %v782_v26 }
 0x205   : > { %v821_v29 = vmax.f32 %v791_v25, 0.0 }
 0x206   : > { %v819_v30 = vmax.f32 %v783_v28, 0.0 }
 0x207   : > { %v831_v31 = vpack.c.bf16 %v821_v29, %v820_v24 }
 0x208   : > { %v830_v32 = vpack.c.bf16 %v819_v30, %v818_v27  ;;  %v1886_v33 = vpop.f32.mrb[28].mxu1 }
 0x209   : > { %v804_v34 = vadd.f32 %v1886_v33, %v1653_v53  ;;  %v795_v35 = vpop.f32.mrb[29].mxu1 }
 0x20a   : > { %1912 = vmatprep.mubr.bf16.mxu1 %v830_v32  ;;  %v796_v36 = vadd.f32 %v1653_v53, %v795_v35  ;;  %v1887_v37 = vpop.f32.mrb[30].mxu1 }
 0x20b   : > { %1913 = vmatmul.mubr.bf16.gmra.mrb[40].mxu1 %v831_v31  ;;  %v824_v38 = vmax.f32 %v804_v34, 0.0  ;;  %v807_v39 = vadd.f32 %v1887_v37, %v1653_v53  ;;  %v798_v10 = vpop.f32.mrb[31].mxu1 }
 0x20c   : > { %v822_v41 = vmax.f32 %v796_v36, 0.0  ;;  %v799_v40 = vadd.f32 %v1653_v53, %v798_v10 }
 0x20d   : > { %v825_v42 = vmax.f32 %v807_v39, 0.0 }
 0x20e   : > { %v823_v43 = vmax.f32 %v799_v40, 0.0 }
 0x20f   : > { %v833_v44 = vpack.c.bf16 %v825_v42, %v824_v38 }
 0x210   : > { %v832_v45 = vpack.c.bf16 %v823_v43, %v822_v41 }
 0x212   : > { %1916 = vmatprep.mubr.bf16.mxu1 %v832_v45 }
 0x213   : > { %1917 = vmatmul.mubr.bf16.gmra.mrb[44].mxu1 %v833_v44  ;;  %v1044_v44 = vlaneseq }
 0x215   : > { %v1045_v45 = vshrl.u32 %v1044_v44, 7 }
 0x217   : > { %v1046_v46 = vsub.s32 0, %v1045_v45  ;;  %v1050_v48 = vsub.s32 1, %v1045_v45 }
 0x219   : > { %v2555_v49 = vrot.slane %v1042_v47, %v1046_v46 }
 0x2c6   : > { %v1906_v52 = vpop.f32.mrb[32].mxu1 }
 0x2c7   : > { %v948_v53 = vadd.f32 %v1906_v52, %v1662_v51  ;;  %v939_v54 = vpop.f32.mrb[33].mxu1 }
 0x2c8   : > { %v940_v55 = vadd.f32 %v1662_v51, %v939_v54  ;;  %v1907_v56 = vpop.f32.mrb[34].mxu1 }
 0x2c9   : > { %v951_v57 = vadd.f32 %v1907_v56, %v1662_v51  ;;  %v942_v58 = vpop.f32.mrb[35].mxu1  ;;  %v1004_v60 = vmax.f32 %v948_v53, 0.0 }
 0x2ca   : > { %v943_v59 = vadd.f32 %v1662_v51, %v942_v58  ;;  %v1002_v62 = vmax.f32 %v940_v55, 0.0 }
 0x2cb   : > { %v1005_v61 = vmax.f32 %v951_v57, 0.0 }
 0x2cc   : > { %v1003_v63 = vmax.f32 %v943_v59, 0.0 }
 0x2cd   : > { %v1019_v0 = vpack.c.bf16 %v1005_v61, %v1004_v60 }
 0x2ce   : > { %v1018_v1 = vpack.c.bf16 %v1003_v63, %v1002_v62 }
 0x2d0   : > { %1167 = vmatmul.mubr.bf16.vlgmr.msra.gmra.mrb[16].mxu0 %v1018_v1 }
 0x2d1   : > { %1176 = vmatprep.mubr.bf16.mxu0 %v2226_v50 }
 0x2d6   : > { %v1910_v2 = vpop.f32.mrb[36].mxu1 }
 0x2d7   : > { %v964_v3 = vadd.f32 %v1910_v2, %v1662_v51  ;;  %v955_v4 = vpop.f32.mrb[37].mxu1 }
 0x2d8   : > { %v956_v5 = vadd.f32 %v1662_v51, %v955_v4  ;;  %v1911_v6 = vpop.f32.mrb[38].mxu1  ;;  %1177 = vmatmul.mubr.bf16.gmra.mrb[20].mxu0 %v1019_v0 }
 0x2d9   : > { %v967_v7 = vadd.f32 %v1911_v6, %v1662_v51  ;;  %v958_v9 = vpop.f32.mrb[39].mxu1  ;;  %1186 = vmatprep.mubr.bf16.mxu0 %v2226_v50  ;;  %v1008_v12 = vmax.f32 %v964_v3, 0.0 }
 0x2da   : > { %v959_v11 = vadd.f32 %v1662_v51, %v958_v9  ;;  %v1006_v14 = vmax.f32 %v956_v5, 0.0 }
 0x2db   : > { %v1009_v13 = vmax.f32 %v967_v7, 0.0 }
 0x2dc   : > { %v1007_v15 = vmax.f32 %v959_v11, 0.0 }
 0x2dd   : > { %v1021_v16 = vpack.c.bf16 %v1009_v13, %v1008_v12 }
 0x2de   : > { %v1020_v17 = vpack.c.bf16 %v1007_v15, %v1006_v14  ;;  %v1914_v18 = vpop.f32.mrb[40].mxu1 }
 0x2df   : > { %v980_v8 = vadd.f32 %v1914_v18, %v1662_v51  ;;  %v971_v19 = vpop.f32.mrb[41].mxu1 }
 0x2e0   : > { %v972_v20 = vadd.f32 %v1662_v51, %v971_v19  ;;  %v1915_v21 = vpop.f32.mrb[42].mxu1  ;;  %1187 = vmatmul.mubr.bf16.gmra.mrb[24].mxu0 %v1020_v17 }
 0x2e1   : > { %v1012_v22 = vmax.f32 %v980_v8, 0.0  ;;  %v983_v23 = vadd.f32 %v1915_v21, %v1662_v51  ;;  %v974_v24 = vpop.f32.mrb[43].mxu1  ;;  %1196 = vmatprep.mubr.bf16.mxu0 %v2226_v50 }
 0x2e2   : > { %v975_v25 = vadd.f32 %v1662_v51, %v974_v24  ;;  %v1010_v27 = vmax.f32 %v972_v20, 0.0 }
 0x2e3   : > { %v1013_v26 = vmax.f32 %v983_v23, 0.0 }
 0x2e4   : > { %v1011_v28 = vmax.f32 %v975_v25, 0.0 }
 0x2e5   : > { %v1023_v29 = vpack.c.bf16 %v1013_v26, %v1012_v22 }
 0x2e6   : > { %v1022_v30 = vpack.c.bf16 %v1011_v28, %v1010_v27  ;;  %v1918_v31 = vpop.f32.mrb[44].mxu1 }
 0x2e7   : > { %v996_v32 = vadd.f32 %v1918_v31, %v1662_v51  ;;  %v987_v33 = vpop.f32.mrb[45].mxu1 }
 0x2e8   : > { %1197 = vmatmul.mubr.bf16.gmra.mrb[28].mxu0 %v1021_v16  ;;  %v988_v34 = vadd.f32 %v1662_v51, %v987_v33  ;;  %v1919_v35 = vpop.f32.mrb[46].mxu1 }
 0x2e9   : > { %v1016_v36 = vmax.f32 %v996_v32, 0.0  ;;  %v999_v37 = vadd.f32 %v1919_v35, %v1662_v51  ;;  %v990_v38 = vpop.f32.mrb[47].mxu1  ;;  %1206 = vmatprep.mubr.bf16.mxu0 %v2226_v50 }
 0x2ea   : > { %v1014_v39 = vmax.f32 %v988_v34, 0.0  ;;  %v991_v10 = vadd.f32 %v1662_v51, %v990_v38  ;;  %v2557_v51 = vrot.slane %v1042_v47, %v1050_v48 }
 0x2eb   : > { %v1017_v41 = vmax.f32 %v999_v37, 0.0 }
 0x2ec   : > { %v1015_v40 = vmax.f32 %v991_v10, 0.0 }
 0x2ed   : > { %v1025_v42 = vpack.c.bf16 %v1017_v41, %v1016_v36 }
 0x2ee   : > { %v1024_v43 = vpack.c.bf16 %v1015_v40, %v1014_v39 }
 0x2f0   : > { %1207 = vmatmul.mubr.bf16.gmra.mrb[32].mxu0 %v1022_v30 }
 0x2f1   : > { %1216 = vmatprep.mubr.bf16.mxu0 %v2226_v50 }
 0x2f8   : > { %1217 = vmatmul.mubr.bf16.gmra.mrb[36].mxu0 %v1023_v29 }
 0x2f9   : > { %1226 = vmatprep.mubr.bf16.mxu0 %v2226_v50 }
 0x300   : > { %1227 = vmatmul.mubr.bf16.gmra.mrb[40].mxu0 %v1024_v43 }
 0x301   : > { %1236 = vmatprep.mubr.bf16.mxu0 %v2226_v50 }
 0x308   : > { %1237 = vmatmul.mubr.bf16.gmra.mrb[44].mxu0 %v1025_v42 }
 0x3a3   : > { %v1168_v52 = vpop.f32.mrb[16].mxu0 }
 0x3a4   : > { %v1169_v53 = vadd.f32 %v1168_v52, %v2555_v49  ;;  %v1170_v54 = vpop.f32.mrb[17].mxu0 }
 0x3a5   : > { %v1171_v55 = vadd.f32 %v1170_v54, %v2557_v51  ;;  %v1172_v50 = vpop.f32.mrb[18].mxu0 }
 0x3a6   : > { %v1687_v56 = vmul.f32 -1.442695, %v1169_v53  ;;  %v1173_v57 = vadd.f32 %v1172_v50, %v2555_v49  ;;  %v1174_v58 = vpop.f32.mrb[19].mxu0 }
 0x3a7   : > { %v1688_v59 = vmul.f32 -1.442695, %v1171_v55  ;;  %v1175_v60 = vadd.f32 %v1174_v58, %v2557_v51 }
 0x3a8   : > { %2034 = vpow2.f32 %v1687_v56  ;;  %v1689_v61 = vmul.f32 -1.442695, %v1173_v57 }
 0x3a9   : > { %2036 = vpow2.f32 %v1688_v59  ;;  %v1690_v62 = vmul.f32 -1.442695, %v1175_v60 }
 0x3aa   : > { %2038 = vpow2.f32 %v1689_v61 }
 0x3ab   : > { %2040 = vpow2.f32 %v1690_v62  ;;  %v1178_v63 = vpop.f32.mrb[20].mxu0 }
 0x3ac   : > { %v1179_v0 = vadd.f32 %v1178_v63, %v2555_v49  ;;  %v1180_v1 = vpop.f32.mrb[21].mxu0 }
 0x3ad   : > { %v1181_v2 = vadd.f32 %v1180_v1, %v2557_v51  ;;  %v1182_v3 = vpop.f32.mrb[22].mxu0 }
 0x3ae   : > { %v1691_v4 = vmul.f32 -1.442695, %v1179_v0  ;;  %v1183_v5 = vadd.f32 %v1182_v3, %v2555_v49  ;;  %v1184_v6 = vpop.f32.mrb[23].mxu0 }
 0x3af   : > { %v1692_v7 = vmul.f32 -1.442695, %v1181_v2  ;;  %v1185_v9 = vadd.f32 %v1184_v6, %v2557_v51 }
 0x3b0   : > { %2042 = vpow2.f32 %v1691_v4  ;;  %v1693_v11 = vmul.f32 -1.442695, %v1183_v5 }
 0x3b1   : > { %2044 = vpow2.f32 %v1692_v7  ;;  %v1694_v12 = vmul.f32 -1.442695, %v1185_v9 }
 0x3b2   : > { %v2035_v13 = vpop.eup %2034  ;;  %2046 = vpow2.f32 %v1693_v11 }
 0x3b3   : > { %v2037_v14 = vpop.eup %2036  ;;  %v1343_v15 = vadd.f32 1.0, %v2035_v13  ;;  %2048 = vpow2.f32 %v1694_v12  ;;  %v1188_v16 = vpop.f32.mrb[24].mxu0 }
 0x3b4   : > { %v2039_v17 = vpop.eup %2038  ;;  %v1344_v18 = vadd.f32 1.0, %v2037_v14  ;;  %v1189_v8 = vadd.f32 %v1188_v16, %v2555_v49  ;;  %v1190_v19 = vpop.f32.mrb[25].mxu0 }
 0x3b5   : > { %v2041_v20 = vpop.eup %2040  ;;  %2050 = vrcp.f32 %v1343_v15  ;;  %v1345_v21 = vadd.f32 1.0, %v2039_v17  ;;  %v1191_v22 = vadd.f32 %v1190_v19, %v2557_v51  ;;  %v1192_v23 = vpop.f32.mrb[26].mxu0 }
 0x3b6   : > { %2052 = vrcp.f32 %v1344_v18  ;;  %v1346_v24 = vadd.f32 1.0, %v2041_v20  ;;  %v1695_v25 = vmul.f32 -1.442695, %v1189_v8  ;;  %v1193_v26 = vadd.f32 %v1192_v23, %v2555_v49  ;;  %v1194_v27 = vpop.f32.mrb[27].mxu0 }
 0x3b7   : > { %2054 = vrcp.f32 %v1345_v21  ;;  %v1696_v28 = vmul.f32 -1.442695, %v1191_v22  ;;  %v1195_v29 = vadd.f32 %v1194_v27, %v2557_v51 }
 0x3b8   : > { %2056 = vrcp.f32 %v1346_v24  ;;  %v1697_v30 = vmul.f32 -1.442695, %v1193_v26 }
 0x3b9   : > { %2058 = vpow2.f32 %v1695_v25  ;;  %v1698_v31 = vmul.f32 -1.442695, %v1195_v29 }
 0x3ba   : > { %v2043_v32 = vpop.eup %2042  ;;  %2060 = vpow2.f32 %v1696_v28 }
 0x3bb   : > { %v2045_v33 = vpop.eup %2044  ;;  %v1347_v34 = vadd.f32 1.0, %v2043_v32  ;;  %2062 = vpow2.f32 %v1697_v30  ;;  %v1198_v35 = vpop.f32.mrb[28].mxu0 }
 0x3bc   : > { %v2047_v36 = vpop.eup %2046  ;;  %v1348_v37 = vadd.f32 1.0, %v2045_v33  ;;  %2064 = vpow2.f32 %v1698_v31  ;;  %v1199_v38 = vadd.f32 %v1198_v35, %v2555_v49  ;;  %v1200_v39 = vpop.f32.mrb[29].mxu0 }
 0x3bd   : > { %v2049_v10 = vpop.eup %2048  ;;  %2066 = vrcp.f32 %v1347_v34  ;;  %v1349_v41 = vadd.f32 1.0, %v2047_v36  ;;  %v1201_v40 = vadd.f32 %v1200_v39, %v2557_v51  ;;  %v1202_v42 = vpop.f32.mrb[30].mxu0 }
 0x3be   : > { %2068 = vrcp.f32 %v1348_v37  ;;  %v1350_v43 = vadd.f32 1.0, %v2049_v10  ;;  %v1699_v44 = vmul.f32 -1.442695, %v1199_v38  ;;  %v1203_v45 = vadd.f32 %v1202_v42, %v2555_v49  ;;  %v1204_v46 = vpop.f32.mrb[31].mxu0 }
 0x3bf   : > { %v2051_v47 = vpop.eup %2050  ;;  %2070 = vrcp.f32 %v1349_v41  ;;  %v1700_v48 = vmul.f32 -1.442695, %v1201_v40  ;;  %v1205_v52 = vadd.f32 %v1204_v46, %v2557_v51 }
 0x3c0   : > { %v2053_v53 = vpop.eup %2052  ;;  %2072 = vrcp.f32 %v1350_v43  ;;  %v1701_v54 = vmul.f32 -1.442695, %v1203_v45 }
 0x3c1   : > { %v2055_v55 = vpop.eup %2054  ;;  %v1742_v50 = vpack.c.bf16 %v2053_v53, %v2051_v47  ;;  %2074 = vpow2.f32 %v1699_v44  ;;  %v1702_v56 = vmul.f32 -1.442695, %v1205_v52 }
 0x3c2   : > { %v2057_v57 = vpop.eup %2056  ;;  %2076 = vpow2.f32 %v1700_v48 }
 0x3c3   : > { %v2059_v58 = vpop.eup %2058  ;;  %1535 = vst [vmem:[%s2578_s17] sm:$0xff] %v1742_v50  ;;  %v1743_v59 = vpack.c.bf16 %v2057_v57, %v2055_v55  ;;  %2078 = vpow2.f32 %v1701_v54  ;;  %v1208_v60 = vpop.f32.mrb[32].mxu0 }
 0x3c4   : > { %v2061_v61 = vpop.eup %2060  ;;  %v1351_v62 = vadd.f32 1.0, %v2059_v58  ;;  %2080 = vpow2.f32 %v1702_v56  ;;  %v1209_v63 = vadd.f32 %v1208_v60, %v2555_v49  ;;  %v1210_v0 = vpop.f32.mrb[33].mxu0 }
 0x3c5   : > { %v2063_v1 = vpop.eup %2062  ;;  %1536 = vst [vmem:[%s2578_s17 + $0x8] sm:$0xff] %v1743_v59  ;;  %v1352_v2 = vadd.f32 1.0, %v2061_v61  ;;  %v1211_v3 = vadd.f32 %v1210_v0, %v2557_v51  ;;  %v1212_v4 = vpop.f32.mrb[34].mxu0 }
 0x3c6   : > { %v2065_v5 = vpop.eup %2064  ;;  %2082 = vrcp.f32 %v1351_v62  ;;  %v1353_v6 = vadd.f32 1.0, %v2063_v1  ;;  %v1703_v7 = vmul.f32 -1.442695, %v1209_v63  ;;  %v1213_v9 = vadd.f32 %v1212_v4, %v2555_v49  ;;  %v1214_v11 = vpop.f32.mrb[35].mxu0 }
 0x3c7   : > { %v2067_v12 = vpop.eup %2066  ;;  %2084 = vrcp.f32 %v1352_v2  ;;  %v1354_v13 = vadd.f32 1.0, %v2065_v5  ;;  %v1704_v14 = vmul.f32 -1.442695, %v1211_v3  ;;  %v1215_v15 = vadd.f32 %v1214_v11, %v2557_v51 }
 0x3c8   : > { %v2069_v16 = vpop.eup %2068  ;;  %2086 = vrcp.f32 %v1353_v6  ;;  %v1705_v17 = vmul.f32 -1.442695, %v1213_v9 }
 0x3c9   : > { %v2071_v18 = vpop.eup %2070  ;;  %v1744_v8 = vpack.c.bf16 %v2069_v16, %v2067_v12  ;;  %2088 = vrcp.f32 %v1354_v13  ;;  %v1706_v19 = vmul.f32 -1.442695, %v1215_v15 }
 0x3ca   : > { %v2073_v20 = vpop.eup %2072  ;;  %2090 = vpow2.f32 %v1703_v7 }
 0x3cb   : > { %v2075_v21 = vpop.eup %2074  ;;  %1537 = vst [vmem:[%s2578_s17 + $0x10] sm:$0xff] %v1744_v8  ;;  %v1745_v22 = vpack.c.bf16 %v2073_v20, %v2071_v18  ;;  %2092 = vpow2.f32 %v1704_v14  ;;  %v1218_v23 = vpop.f32.mrb[36].mxu0 }
 0x3cc   : > { %v2077_v24 = vpop.eup %2076  ;;  %v1355_v25 = vadd.f32 1.0, %v2075_v21  ;;  %2094 = vpow2.f32 %v1705_v17  ;;  %v1219_v26 = vadd.f32 %v1218_v23, %v2555_v49  ;;  %v1220_v27 = vpop.f32.mrb[37].mxu0 }
 0x3cd   : > { %v2079_v28 = vpop.eup %2078  ;;  %1538 = vst [vmem:[%s2578_s17 + $0x18] sm:$0xff] %v1745_v22  ;;  %v1356_v29 = vadd.f32 1.0, %v2077_v24  ;;  %2096 = vpow2.f32 %v1706_v19  ;;  %v1221_v30 = vadd.f32 %v1220_v27, %v2557_v51  ;;  %v1222_v31 = vpop.f32.mrb[38].mxu0 }
 0x3ce   : > { %v2081_v32 = vpop.eup %2080  ;;  %2098 = vrcp.f32 %v1355_v25  ;;  %v1357_v33 = vadd.f32 1.0, %v2079_v28  ;;  %v1707_v34 = vmul.f32 -1.442695, %v1219_v26  ;;  %v1223_v35 = vadd.f32 %v1222_v31, %v2555_v49  ;;  %v1224_v36 = vpop.f32.mrb[39].mxu0 }
 0x3cf   : > { %2100 = vrcp.f32 %v1356_v29  ;;  %v1358_v37 = vadd.f32 1.0, %v2081_v32  ;;  %v1708_v38 = vmul.f32 -1.442695, %v1221_v30  ;;  %v1225_v39 = vadd.f32 %v1224_v36, %v2557_v51 }
 0x3d0   : > { %v2083_v10 = vpop.eup %2082  ;;  %2102 = vrcp.f32 %v1357_v33  ;;  %v1709_v41 = vmul.f32 -1.442695, %v1223_v35 }
 0x3d1   : > { %v2085_v40 = vpop.eup %2084  ;;  %2104 = vrcp.f32 %v1358_v37  ;;  %v1710_v42 = vmul.f32 -1.442695, %v1225_v39 }
 0x3d2   : > { %v2087_v43 = vpop.eup %2086  ;;  %v1746_v44 = vpack.c.bf16 %v2085_v40, %v2083_v10  ;;  %2106 = vpow2.f32 %v1707_v34 }
 0x3d3   : > { %v2089_v45 = vpop.eup %2088  ;;  %2108 = vpow2.f32 %v1708_v38  ;;  %v1228_v46 = vpop.f32.mrb[40].mxu0 }
 0x3d4   : > { %v2091_v47 = vpop.eup %2090  ;;  %1539 = vst [vmem:[%s2578_s17 + $0x20] sm:$0xff] %v1746_v44  ;;  %v1747_v48 = vpack.c.bf16 %v2089_v45, %v2087_v43  ;;  %2110 = vpow2.f32 %v1709_v41  ;;  %v1229_v52 = vadd.f32 %v1228_v46, %v2555_v49  ;;  %v1230_v53 = vpop.f32.mrb[41].mxu0 }
 0x3d5   : > { %v2093_v54 = vpop.eup %2092  ;;  %v1359_v55 = vadd.f32 1.0, %v2091_v47  ;;  %2112 = vpow2.f32 %v1710_v42  ;;  %v1231_v50 = vadd.f32 %v1230_v53, %v2557_v51  ;;  %v1232_v56 = vpop.f32.mrb[42].mxu0 }
 0x3d6   : > { %v2095_v57 = vpop.eup %2094  ;;  %1540 = vst [vmem:[%s2578_s17 + $0x28] sm:$0xff] %v1747_v48  ;;  %v1360_v58 = vadd.f32 1.0, %v2093_v54  ;;  %v1233_v59 = vadd.f32 %v1232_v56, %v2555_v49  ;;  %v1234_v60 = vpop.f32.mrb[43].mxu0  ;;  %v1711_v63 = vmul.f32 -1.442695, %v1229_v52 }
 0x3d7   : > { %v2097_v61 = vpop.eup %2096  ;;  %2114 = vrcp.f32 %v1359_v55  ;;  %v1361_v62 = vadd.f32 1.0, %v2095_v57  ;;  %v1235_v0 = vadd.f32 %v1234_v60, %v2557_v51  ;;  %v1712_v3 = vmul.f32 -1.442695, %v1231_v50 }
 0x3d8   : > { %v2099_v1 = vpop.eup %2098  ;;  %2116 = vrcp.f32 %v1360_v58  ;;  %v1362_v2 = vadd.f32 1.0, %v2097_v61  ;;  %v1713_v5 = vmul.f32 -1.442695, %v1233_v59 }
 0x3d9   : > { %v2101_v4 = vpop.eup %2100  ;;  %2118 = vrcp.f32 %v1361_v62  ;;  %v1714_v9 = vmul.f32 -1.442695, %v1235_v0 }
 0x3da   : > { %v2103_v6 = vpop.eup %2102  ;;  %v1748_v7 = vpack.c.bf16 %v2101_v4, %v2099_v1  ;;  %2120 = vrcp.f32 %v1362_v2 }
 0x3db   : > { %v2105_v11 = vpop.eup %2104  ;;  %2122 = vpow2.f32 %v1711_v63  ;;  %v1238_v12 = vpop.f32.mrb[44].mxu0 }
 0x3dc   : > { %v2107_v13 = vpop.eup %2106  ;;  %1541 = vst [vmem:[%s2578_s17 + $0x30] sm:$0xff] %v1748_v7  ;;  %v1749_v14 = vpack.c.bf16 %v2105_v11, %v2103_v6  ;;  %2124 = vpow2.f32 %v1712_v3  ;;  %v1239_v15 = vadd.f32 %v1238_v12, %v2555_v49  ;;  %v1240_v16 = vpop.f32.mrb[45].mxu0 }
 0x3dd   : > { %v2109_v17 = vpop.eup %2108  ;;  %v1363_v18 = vadd.f32 1.0, %v2107_v13  ;;  %2126 = vpow2.f32 %v1713_v5  ;;  %v1241_v8 = vadd.f32 %v1240_v16, %v2557_v51  ;;  %v1242_v19 = vpop.f32.mrb[46].mxu0 }
 0x3de   : > { %v2111_v20 = vpop.eup %2110  ;;  %1542 = vst [vmem:[%s2578_s17 + $0x38] sm:$0xff] %v1749_v14  ;;  %v1364_v21 = vadd.f32 1.0, %v2109_v17  ;;  %2128 = vpow2.f32 %v1714_v9  ;;  %v1243_v22 = vadd.f32 %v1242_v19, %v2555_v49  ;;  %v1244_v23 = vpop.f32.mrb[47].mxu0  ;;  %v1715_v26 = vmul.f32 -1.442695, %v1239_v15 }
 0x3df   : > { %v2113_v24 = vpop.eup %2112  ;;  %2130 = vrcp.f32 %v1363_v18  ;;  %v1365_v25 = vadd.f32 1.0, %v2111_v20  ;;  %v1245_v27 = vadd.f32 %v1244_v23, %v2557_v51  ;;  %v1716_v29 = vmul.f32 -1.442695, %v1241_v8 }
 0x3e0   : > { %2132 = vrcp.f32 %v1364_v21  ;;  %v1366_v28 = vadd.f32 1.0, %v2113_v24  ;;  %v1717_v31 = vmul.f32 -1.442695, %v1243_v22 }
 0x3e1   : > { %v2115_v30 = vpop.eup %2114  ;;  %2134 = vrcp.f32 %v1365_v25  ;;  %v1718_v33 = vmul.f32 -1.442695, %v1245_v27 }
 0x3e2   : > { %v2117_v32 = vpop.eup %2116  ;;  %2136 = vrcp.f32 %v1366_v28 }
 0x3e3   : > { %v2119_v34 = vpop.eup %2118  ;;  %v1750_v49 = vpack.c.bf16 %v2117_v32, %v2115_v30  ;;  %2138 = vpow2.f32 %v1715_v26 }
 0x3e4   : > { %v2121_v35 = vpop.eup %2120  ;;  %2140 = vpow2.f32 %v1716_v29 }
 0x3e5   : > { %v2123_v36 = vpop.eup %2122  ;;  %1543 = vst [vmem:[%s2578_s17 + $0x40] sm:$0xff] %v1750_v49  ;;  %v1751_v37 = vpack.c.bf16 %v2121_v35, %v2119_v34  ;;  %2142 = vpow2.f32 %v1717_v31 }
 0x3e6   : > { %v2125_v51 = vpop.eup %2124  ;;  %v1367_v38 = vadd.f32 1.0, %v2123_v36  ;;  %2144 = vpow2.f32 %v1718_v33 }
 0x3e7   : > { %v2127_v39 = vpop.eup %2126  ;;  %1544 = vst [vmem:[%s2578_s17 + $0x48] sm:$0xff] %v1751_v37  ;;  %v1368_v10 = vadd.f32 1.0, %v2125_v51 }
 0x3e8   : > { %v2129_v41 = vpop.eup %2128  ;;  %2146 = vrcp.f32 %v1367_v38  ;;  %v1369_v40 = vadd.f32 1.0, %v2127_v39 }
 0x3e9   : > { %v2131_v42 = vpop.eup %2130  ;;  %2148 = vrcp.f32 %v1368_v10  ;;  %v1370_v43 = vadd.f32 1.0, %v2129_v41 }
 0x3ea   : > { %v2133_v44 = vpop.eup %2132  ;;  %2150 = vrcp.f32 %v1369_v40 }
 0x3eb   : > { %v2135_v45 = vpop.eup %2134  ;;  %v1752_v46 = vpack.c.bf16 %v2133_v44, %v2131_v42  ;;  %2152 = vrcp.f32 %v1370_v43 }
 0x3ec   : > { %v2137_v47 = vpop.eup %2136 }
 0x3ed   : > { %v2139_v48 = vpop.eup %2138  ;;  %1545 = vst [vmem:[%s2578_s17 + $0x50] sm:$0xff] %v1752_v46  ;;  %v1753_v52 = vpack.c.bf16 %v2137_v47, %v2135_v45 }
 0x3ee   : > { %v2141_v53 = vpop.eup %2140  ;;  %v1371_v54 = vadd.f32 1.0, %v2139_v48 }
 0x3ef   : > { %v2143_v55 = vpop.eup %2142  ;;  %1546 = vst [vmem:[%s2578_s17 + $0x58] sm:$0xff] %v1753_v52  ;;  %v1372_v50 = vadd.f32 1.0, %v2141_v53 }
 0x3f0   : > { %v2145_v56 = vpop.eup %2144  ;;  %2154 = vrcp.f32 %v1371_v54  ;;  %v1373_v57 = vadd.f32 1.0, %v2143_v55 }
 0x3f1   : > { %2156 = vrcp.f32 %v1372_v50  ;;  %v1374_v58 = vadd.f32 1.0, %v2145_v56 }
 0x3f2   : > { %v2147_v59 = vpop.eup %2146  ;;  %2158 = vrcp.f32 %v1373_v57 }
 0x3f3   : > { %v2149_v60 = vpop.eup %2148  ;;  %2160 = vrcp.f32 %v1374_v58 }
 0x3f4   : > { %v2151_v61 = vpop.eup %2150  ;;  %v1754_v62 = vpack.c.bf16 %v2149_v60, %v2147_v59 }
 0x3f5   : > { %v2153_v63 = vpop.eup %2152 }
 0x3f6   : > { %1547 = vst [vmem:[%s2578_s17 + $0x60] sm:$0xff] %v1754_v62  ;;  %v1755_v0 = vpack.c.bf16 %v2153_v63, %v2151_v61 }
 0x3f8   : > { %1548 = vst [vmem:[%s2578_s17 + $0x68] sm:$0xff] %v1755_v0 }
 0x3fa   : > { %v2155_v1 = vpop.eup %2154 }
 0x3fb   : > { %v2157_v2 = vpop.eup %2156 }
 0x3fc   : > { %v2159_v3 = vpop.eup %2158  ;;  %v1756_v4 = vpack.c.bf16 %v2157_v2, %v2155_v1 }
 0x3fd   : > { %v2161_v5 = vpop.eup %2160 }
 0x3fe   : > { %1549 = vst [vmem:[%s2578_s17 + $0x70] sm:$0xff] %v1756_v4  ;;  %v1757_v6 = vpack.c.bf16 %v2161_v5, %v2159_v3 }
 0x400   : > { %1550 = vst [vmem:[%s2578_s17 + $0x78] sm:$0xff] %v1757_v6 }
 0x401   : > { %2175 = shalt.err (!%p2172_p3)
}
 0x402   : > { %s2176_s25 = scalar_lea.hbm %s2615_s16, 2048  ;;  %s2180_s27 = scalar_lea.hbm %s2673_s9, 8192 }
 0x403   : > { %p2177_p4 = scmp.ne.s32.totalorder %s2615_s16, %s2176_s25  ;;  %p2181_p9 = scmp.lt.u32.totalorder %s2615_s16, %s2673_s9 }
 0x404   : > { %p2182_p10 = scmp.lt.u32.totalorder %s2180_s27, %s2176_s25  ;;  %p2184_p12 = scmp.lt.u32.totalorder %s2176_s25, %s2615_s16 }
 0x405   : > { %p2178_p7 = pnand %p2177_p4, %p2318_p5 }
 0x406   : > { %p2183_p11 = por %p2182_p10, %p2181_p9 }
 0x407   : > { %p2179_p8 = pneg %p2178_p7 }
 0x408   : > { %p2185_p13 = por %p2184_p12, %p2183_p11 }
 0x40a   : > { %p2186_p0 = pnand %p2185_p13, %p2179_p8 }
 0x40c   : > { %2189 = shalt.err (!%p2186_p0)
}
 0x40d   : > { %s2228_s23 = smov 128   ;;  %s2229_s21 = smov 8  }
 0x40e   : > { %1936 = dma.vmem_to_hbm [thread:$0]  (%p2318_p5), %s2617_s28, 2048, %s2615_s16, %s2623_s13, %s2228_s23, %s2228_s23, %s2229_s21  }
 0x40f PF: > { %p1942_p1 = scmp.ge.s32.totalorder %s2224_s12, 2  ;;  %s1581_s22 = sand.u32 1, %s2212_s30  }
 0x410   : > { %s1582_s24 = scalar_lea.sflag [#allocation3], %s1581_s22 }
 0x411   : > { %p1939_p2 = pnand %p1942_p1, %p2322_p6 }
 0x413   : > { %2207 = dma.done.wait (!%p1939_p2), %s1582_s24, 2048  }
 0x414   : > { %2209 = vsyncadd (!%p1939_p2), %s1582_s24, 4294965248  ;;  %p19_p3 = scmp.ge.s32.totalorder %s2305_s15, 6   ;;  %s2676_s30 = smov %s2216_s10 }
 0x415   : > { %s2677_s10 = smov %s2220_s11  ;;  %s2678_s11 = smov %s2316_s18 }
 0x416   : > { %s2679_s12 = smov %s2305_s15  ;;  %21 = sbr.rel (!%p19_p3) target bundleno = 3 (0x3), region = 91 }
 0x41d   :  { %1587 = vsyncpa [#allocation3], 1 }
 0x41e   :  { %1589 = vsyncpa [#allocation3 + $0x1], 1 }

</bundles_post_ra>
